<compile_context>
chip_gen: v7x
topology: tpu7x:2x2x1
jax: 0.10.0
libtpu: 0.0.40
codegen_flags: <defaults>
</compile_context>

<pallas_src>
import math
import jax
import jax.numpy as jnp
from jax.experimental import pallas as pl
from jax.experimental.pallas import tpu as pltpu


def _round_up(x, m):
    return ((x + m - 1) // m) * m


def _prob_linear_kernel(x_ref, wt_ref, o_ref, acc_ref, rsum_ref):
    """One (tm, tn) output tile; the k grid axis accumulates over IN.

    wt_ref holds the transposed weight tile (tk, tn), so
      acc[b, o]  += sum_k x[b, k] * w[o, k]
      rsum[0, o] += sum_k w[o, k]
      out[b, o]   = acc[b, o] / rsum[0, o]
                  == (x @ (w / w.sum(1, keepdims=True)).T)[b, o]
    """
    k = pl.program_id(2)

    @pl.when(k == 0)
    def _():
        acc_ref[...] = jnp.zeros_like(acc_ref)
        rsum_ref[...] = jnp.zeros_like(rsum_ref)

    wt = wt_ref[...]                                            # (tk, tn)
    acc_ref[...] += jnp.dot(x_ref[...], wt,
                            preferred_element_type=jnp.float32)
    # Column-sum of the transposed tile == row-sum of the original weight.
    # Sublane reduction: runs on the XLU/VPU slots under the MXU push.
    rsum_ref[...] += jnp.sum(wt.astype(jnp.float32), axis=0, keepdims=True)

    @pl.when(k == pl.num_programs(2) - 1)
    def _():
        # Exact reciprocal (matches the reference's true divide) broadcast
        # over the batch rows, then cast to the output dtype.
        inv = 1.0 / rsum_ref[...]                               # (1, tn)
        o_ref[...] = (acc_ref[...] * inv).astype(o_ref.dtype)


def prob_linear(x, weight, *, tile_b=1024, tile_n=1024, tile_k=1024):
    """ProbalisticLinear.forward.   x: (B, IN), weight: (OUT, IN) -> (B, OUT)."""
    B, IN = x.shape
    OUT, IN_w = weight.shape
    assert IN == IN_w

    # ---- tile sizes: lane/MXU aligned, clamped to the (padded) problem size.
    b8 = _round_up(B, 8)
    out128 = _round_up(OUT, 128)
    in128 = _round_up(IN, 128)
    tm = min(tile_b, b8)
    tn = min(tile_n, out128)
    tk = min(tile_k, in128)
    # v7x megacore: if the batch axis is a single block, keep >= 2 blocks on
    # the OUT axis so one "parallel" axis can still shard across the 2 TCs.
    if b8 <= tm and out128 >= 256:
        tn = min(tn, (out128 // 2) // 128 * 128)

    Bp = _round_up(B, tm)
    OUTp = _round_up(OUT, tn)
    INp = _round_up(IN, tk)

    xb = jnp.dtype(x.dtype).itemsize
    wb = jnp.dtype(weight.dtype).itemsize

    # ---- pad x only if needed (zero-padding keeps real row-sums/outputs exact).
    if (Bp, INp) != (B, IN):
        xp = jnp.zeros((Bp, INp), x.dtype).at[:B, :IN].set(x)
    else:
        xp = x

    # ---- padded, pre-transposed weight copy: (INp, OUTp).
    # In a real model `weight` is a static parameter, so this copy would be
    # built once and cached; here it is rebuilt per call to stay self-contained.
    wp = jnp.zeros((INp, OUTp), weight.dtype).at[:IN, :OUT].set(weight.T)
    if OUTp > OUT:
        # Give the padded OUT columns a row-sum of exactly 1 so the in-kernel
        # reciprocal stays finite; those columns are sliced off below.
        wp = wp.at[0, OUT:].set(jnp.asarray(1, weight.dtype))

    # ---- VMEM working set (f32 acc + double-buffered tiles) -> explicit limit.
    vmem_bytes = (tm * tn * 4               # f32 accumulator
                  + 8 * tn * 4              # row-sum scratch (sublane-padded)
                  + 2 * tm * tk * xb        # double-buffered x tiles
                  + 2 * tk * tn * wb        # double-buffered w tiles
                  + 2 * tm * tn * xb)       # double-buffered out tiles
    vmem_limit = min(int(vmem_bytes * 1.5) + (2 << 20), 96 << 20)

    cost = pl.CostEstimate(
        flops=2 * Bp * OUTp * INp,
        transcendentals=0,
        bytes_accessed=Bp * INp * xb + INp * OUTp * wb + Bp * OUTp * xb)

    grid = (Bp // tm, OUTp // tn, INp // tk)
    out = pl.pallas_call(
        _prob_linear_kernel,
        out_shape=jax.ShapeDtypeStruct((Bp, OUTp), x.dtype),
        grid_spec=pltpu.PrefetchScalarGridSpec(
            num_scalar_prefetch=0,
            grid=grid,
            in_specs=[
                pl.BlockSpec((tm, tk), lambda i, j, k: (i, k)),   # x tile
                pl.BlockSpec((tk, tn), lambda i, j, k: (k, j)),   # w.T tile
            ],
            out_specs=pl.BlockSpec((tm, tn), lambda i, j, k: (i, j)),
            scratch_shapes=[
                pltpu.VMEM((tm, tn), jnp.float32),   # acc
                pltpu.VMEM((1, tn), jnp.float32),    # row-sum
            ],
        ),
        compiler_params=pltpu.CompilerParams(
            dimension_semantics=("parallel", "parallel", "arbitrary"),
            vmem_limit_bytes=vmem_limit),
        cost_estimate=cost,
    )(xp, wp)

    if (Bp, OUTp) != (B, OUT):
        out = out[:B, :OUT]
    return out


def kaiming_uniform_init(key, out_features, in_features, a=math.sqrt(5)):
    # Matches torch.nn.init.kaiming_uniform_(weight, a=sqrt(5)) for an
    # (out, in) weight: bound = gain * sqrt(3 / fan_in), gain = sqrt(2/(1+a^2)).
    gain = math.sqrt(2.0 / (1.0 + a * a))
    bound = gain * math.sqrt(3.0 / in_features)
    return jax.random.uniform(
        key, (out_features, in_features), dtype=jnp.float32,
        minval=-bound, maxval=bound)


if __name__ == "__main__":
    key = jax.random.PRNGKey(0)
    k_x, k_w = jax.random.split(key)

    batch = 8
    in_features = 32
    out_features = 16
    eps = 0.1  # TODO(synk): module stores eps but never uses it in forward.

    x = jax.random.normal(k_x, (batch, in_features), dtype=jnp.float32)
    weight = kaiming_uniform_init(k_w, out_features, in_features)

    out = prob_linear(x, weight)
    out = jax.block_until_ready(out)

    # Reference: plain JAX transcription of the PyTorch forward.
    w_norm = weight / jnp.sum(weight, axis=1, keepdims=True)
    ref = x @ w_norm.T
    assert out.shape == (batch, out_features)
    assert jnp.allclose(out, ref, atol=1e-5, rtol=2e-4), float(
        jnp.max(jnp.abs(out - ref)))

    print("KERNEL_OK")
</pallas_src>

<mosaic_0001>
module attributes {stable_mosaic.version = 11 : i64} {
  func.func @_prob_linear_kernel(%arg0: i32, %arg1: i32, %arg2: i32, %arg3: memref<8x128xf32, #tpu.memory_space<vmem>>, %arg4: memref<128x128xf32, #tpu.memory_space<vmem>>, %arg5: memref<8x128xf32, #tpu.memory_space<vmem>>, %arg6: memref<8x128xf32, #tpu.memory_space<vmem>>, %arg7: memref<1x128xf32, #tpu.memory_space<vmem>>) attributes {dimension_semantics = [#tpu.dimension_semantics<parallel>, #tpu.dimension_semantics<parallel>, #tpu.dimension_semantics<arbitrary>], iteration_bounds = array<i64: 1, 1, 1>, scalar_prefetch = 0 : i64, scratch_operands = 2 : i64, tpu.core_type = #tpu.core_type<tc>, window_params = [{transform_indices = @transform_0, window_bounds = array<i64: 8, 128>}, {transform_indices = @transform_1, window_bounds = array<i64: 128, 128>}, {transform_indices = @transform_2, window_bounds = array<i64: 8, 128>}]} {
    %c0_i32 = arith.constant 0 : i32
    %0 = arith.cmpi eq, %arg2, %c0_i32 : i32
    %1 = arith.extui %0 : i1 to i32
    %c0_i32_0 = arith.constant 0 : i32
    %2 = arith.cmpi ne, %1, %c0_i32_0 : i32
    scf.if %2 {
      %cst_15 = arith.constant 0.000000e+00 : f32
      %17 = vector.broadcast %cst_15 : f32 to vector<8x128xf32>
      %c0_16 = arith.constant 0 : index
      %c0_17 = arith.constant 0 : index
      %18 = vector.load %arg6[%c0_16, %c0_17] : memref<8x128xf32, #tpu.memory_space<vmem>>, vector<8x128xf32>
      tpu.vector_store %arg6[%c0_16, %c0_17], %17 {strides = array<i32>} : memref<8x128xf32, #tpu.memory_space<vmem>>, vector<8x128xf32>,
      %cst_18 = arith.constant 0.000000e+00 : f32
      %19 = vector.broadcast %cst_18 : f32 to vector<1x128xf32>
      %c0_19 = arith.constant 0 : index
      %c0_20 = arith.constant 0 : index
      %20 = vector.load %arg7[%c0_19, %c0_20] : memref<1x128xf32, #tpu.memory_space<vmem>>, vector<1x128xf32>
      tpu.vector_store %arg7[%c0_19, %c0_20], %19 {strides = array<i32>} : memref<1x128xf32, #tpu.memory_space<vmem>>, vector<1x128xf32>,
    } else {
    }
    %c0 = arith.constant 0 : index
    %c0_1 = arith.constant 0 : index
    %3 = vector.load %arg4[%c0, %c0_1] : memref<128x128xf32, #tpu.memory_space<vmem>>, vector<128x128xf32>
    %c0_2 = arith.constant 0 : index
    %c0_3 = arith.constant 0 : index
    %4 = vector.load %arg6[%c0_2, %c0_3] : memref<8x128xf32, #tpu.memory_space<vmem>>, vector<8x128xf32>
    %c0_4 = arith.constant 0 : index
    %c0_5 = arith.constant 0 : index
    %5 = vector.load %arg3[%c0_4, %c0_5] : memref<8x128xf32, #tpu.memory_space<vmem>>, vector<8x128xf32>
    %cst = arith.constant dense<0.000000e+00> : vector<8x128xf32>
    %6 = tpu.matmul %5, %3, %cst {dimension_numbers = #tpu.dot_dimension_numbers<[1], [0], [0], [1], [0, 0, 1, 1], [], []>} : vector<8x128xf32>, vector<128x128xf32>, vector<8x128xf32> -> vector<8x128xf32>
    %7 = arith.addf %4, %6 : vector<8x128xf32>
    %c0_6 = arith.constant 0 : index
    %c0_7 = arith.constant 0 : index
    %8 = vector.load %arg6[%c0_6, %c0_7] : memref<8x128xf32, #tpu.memory_space<vmem>>, vector<8x128xf32>
    tpu.vector_store %arg6[%c0_6, %c0_7], %7 {strides = array<i32>} : memref<8x128xf32, #tpu.memory_space<vmem>>, vector<8x128xf32>,
    %c0_8 = arith.constant 0 : index
    %c0_9 = arith.constant 0 : index
    %9 = vector.load %arg7[%c0_8, %c0_9] : memref<1x128xf32, #tpu.memory_space<vmem>>, vector<1x128xf32>
    %cst_10 = arith.constant dense<0.000000e+00> : vector<128xf32>
    %10 = vector.multi_reduction <add>, %3, %cst_10 [0] : vector<128x128xf32> to vector<128xf32>
    %11 = vector.shape_cast %10 : vector<128xf32> to vector<1x128xf32>
    %12 = arith.addf %9, %11 : vector<1x128xf32>
    %c0_11 = arith.constant 0 : index
    %c0_12 = arith.constant 0 : index
    %13 = vector.load %arg7[%c0_11, %c0_12] : memref<1x128xf32, #tpu.memory_space<vmem>>, vector<1x128xf32>
    tpu.vector_store %arg7[%c0_11, %c0_12], %12 {strides = array<i32>} : memref<1x128xf32, #tpu.memory_space<vmem>>, vector<1x128xf32>,
    %c0_i32_13 = arith.constant 0 : i32
    %14 = arith.cmpi eq, %arg2, %c0_i32_13 : i32
    %15 = arith.extui %14 : i1 to i32
    %c0_i32_14 = arith.constant 0 : i32
    %16 = arith.cmpi ne, %15, %c0_i32_14 : i32
    scf.if %16 {
      %c0_15 = arith.constant 0 : index
      %c0_16 = arith.constant 0 : index
      %17 = vector.load %arg7[%c0_15, %c0_16] : memref<1x128xf32, #tpu.memory_space<vmem>>, vector<1x128xf32>
      %cst_17 = arith.constant 1.000000e+00 : f32
      %18 = vector.broadcast %cst_17 : f32 to vector<1x128xf32>
      %19 = arith.divf %18, %17 : vector<1x128xf32>
      %c0_18 = arith.constant 0 : index
      %c0_19 = arith.constant 0 : index
      %20 = vector.load %arg6[%c0_18, %c0_19] : memref<8x128xf32, #tpu.memory_space<vmem>>, vector<8x128xf32>
      %21 = vector.broadcast %19 : vector<1x128xf32> to vector<8x128xf32>
      %22 = arith.mulf %20, %21 : vector<8x128xf32>
      %c0_20 = arith.constant 0 : index
      %c0_21 = arith.constant 0 : index
      %23 = vector.load %arg5[%c0_20, %c0_21] : memref<8x128xf32, #tpu.memory_space<vmem>>, vector<8x128xf32>
      tpu.vector_store %arg5[%c0_20, %c0_21], %22 {strides = array<i32>} : memref<8x128xf32, #tpu.memory_space<vmem>>, vector<8x128xf32>,
    } else {
    }
    return
  }
  func.func @transform_0(%arg0: i32, %arg1: i32, %arg2: i32) -> (i32, i32) {
    %c0_i32 = arith.constant 0 : i32
    return %arg0, %arg2 : i32, i32
  }
  func.func @transform_1(%arg0: i32, %arg1: i32, %arg2: i32) -> (i32, i32) {
    %c0_i32 = arith.constant 0 : i32
    return %arg2, %arg1 : i32, i32
  }
  func.func @transform_2(%arg0: i32, %arg1: i32, %arg2: i32) -> (i32, i32) {
    %c0_i32 = arith.constant 0 : i32
    return %arg0, %arg1 : i32, i32
  }
}

</mosaic_0001>

<bundles_post_ra>
// kernel: tpu_custom_call.1
= control target key start
LH: loop header
LB: loop body
LE: loop exit
PB: predicated region body
PF: predicated region fallthrough
CT: control target
= control target key end

     0   :  { %7 = vsyncpa [#allocation5], 0  ;;  %s413_s0 = inlined_call_operand.hbm [shape: f32[8,128], index: 0, kind: input, shape index: {}]   ;;  %s414_s1 = inlined_call_operand.hbm [shape: f32[128,128], index: 1, kind: input, shape index: {}]   ;;  %s415_s2 = inlined_call_operand.hbm [shape: f32[8,128], index: 2, kind: output, shape index: {}]  }
   0x1   :  { %8 = vsyncpa [#allocation8], 0 }
   0x2   :  { %9 = vsyncpa [#allocation6], 0  ;;  %s347_s9 = smov [#allocation4]   ;;  %s348_s11 = smov [#allocation7]  }
   0x3   :  { %s16_s10 = sshll.u32 %s347_s9, 4  ;;  %s25_s12 = sshll.u32 %s348_s11, 4  ;;  %s17_s10 = int_to_ptr.vmem [resolvable:$true] %s16_s10  ;;  %s370_s12 = int_to_ptr.vmem [resolvable:$true] %s25_s12 }
   0x4   :  { %s275_s15 = scalar_lea.hbm %s413_s0, 128 }
   0x5   :  { %p276_p0 = scmp.ne.s32.totalorder %s413_s0, %s275_s15  ;;  %p279_p1 = scmp.lt.u32.totalorder %s275_s15, %s413_s0 }
   0x7   :  { %p281_p2 = pnand %p279_p1, %p276_p0 }
   0x9   :  { %284 = shalt.err (!%p281_p2)
}
   0xa   :  { %s285_s20 = scalar_lea.vmem %s17_s10, 128  ;;  %p290_p4 = scmp.lt.s32.totalorder %s17_s10, %s17_s10 }
   0xb   :  { %p286_p3 = scmp.ne.s32.totalorder %s17_s10, %s285_s20  ;;  %p291_p5 = scmp.lt.s32.totalorder %s285_s20, %s285_s20 }
   0xd   :  { %p292_p6 = por %p291_p5, %p290_p4 }
   0xf   :  { %p293_p7 = pnand %p292_p6, %p286_p3 }
  0x11   :  { %296 = shalt.err (!%p293_p7)
}
  0x12   :  { %19 = dma.hbm_to_vmem [thread:$0]  %s413_s0, 128, %s17_s10, [#allocation5]  }
  0x13   :  { %s297_s25 = scalar_lea.hbm %s414_s1, 2048 }
  0x14   :  { %p298_p8 = scmp.ne.s32.totalorder %s414_s1, %s297_s25  ;;  %p301_p9 = scmp.lt.u32.totalorder %s297_s25, %s414_s1 }
  0x16   :  { %p303_p10 = pnand %p301_p9, %p298_p8 }
  0x18   :  { %306 = shalt.err (!%p303_p10)
}
  0x19   :  { %s307_s30 = scalar_lea.vmem %s370_s12, 2048  ;;  %p312_p12 = scmp.lt.s32.totalorder %s370_s12, %s370_s12 }
  0x1a   :  { %p308_p11 = scmp.ne.s32.totalorder %s370_s12, %s307_s30  ;;  %p313_p13 = scmp.lt.s32.totalorder %s307_s30, %s307_s30 }
  0x1c   :  { %p314_p0 = por %p313_p13, %p312_p12 }
  0x1e   :  { %p315_p1 = pnand %p314_p0, %p308_p11 }
  0x20   :  { %318 = shalt.err (!%p315_p1)
}
  0x21   :  { %s349_s0 = smov 128   ;;  %s350_s3 = smov 8  }
  0x22   :  { %31 = dma.hbm_to_vmem [thread:$0]  %s414_s1, 2048, %s370_s12, [#allocation8], %s349_s0, %s349_s0, %s350_s3  }
  0x23   :  { %341 = dma.done.wait [#allocation5], 128  }
  0x24   :  { %342 = vsyncadd [#allocation5], 4294967168 }
  0x25   :  { %343 = dma.done.wait [#allocation8], 2048  }
  0x26   :  { %344 = vsyncadd [#allocation8], 4294965248  ;;  %v351_v0 = vmov 0.0|0.0   ;;  %v352_v1 = vmov 0.0   ;;  %vm353_vm0 = vmmov 0   ;;  %v44_v2 = vld [vmem:[#allocation7] sm:$0xff]  ;;  %v166_v51 = vlaneseq }
  0x27   :  { %241 = vmatprep.subr.bf16.mxu0 %v351_v0  ;;  %43 = vst [vmem:[#allocation3] sm:$0x1] %v352_v1  ;;  %238 = vmatprep.mubr.msk.f32.mxu0 %vm353_vm0, %v352_v1  ;;  %v45_v3 = vld [vmem:[#allocation7 + $0x8] sm:$0xff]  ;;  %v46_v4 = vld [vmem:[#allocation7 + $0x10] sm:$0xff]  ;;  %v47_v7 = vld [vmem:[#allocation7 + $0x18] sm:$0xff]  ;;  %s354_s1 = smov [#allocation9]  }
  0x28   :  { %v242_v5 = vpack.c.bf16 %v45_v3, %v44_v2  ;;  %v135_v6 = vadd.f32 %v45_v3, %v44_v2  ;;  %v245_v8 = vpack.c.bf16 %v47_v7, %v46_v4  ;;  %v48_v10 = vld [vmem:[#allocation7 + $0x20] sm:$0xff]  ;;  %v49_v11 = vld [vmem:[#allocation7 + $0x28] sm:$0xff]  ;;  %v50_v15 = vld [vmem:[#allocation7 + $0x30] sm:$0xff]  ;;  %v167_v52 = vshrl.u32 %v166_v51, 7  ;;  %s179_s6 = sshll.u32 %s354_s1, 4  ;;  %s180_s6 = int_to_ptr.vmem [resolvable:$true] %s179_s6 }
  0x29   :  { %v248_v13 = vpack.c.bf16 %v49_v11, %v48_v10  ;;  %v51_v16 = vld [vmem:[#allocation7 + $0x38] sm:$0xff]  ;;  %v52_v20 = vld [vmem:[#allocation7 + $0x40] sm:$0xff]  ;;  %v53_v21 = vld [vmem:[#allocation7 + $0x48] sm:$0xff]  ;;  %s319_s7 = scalar_lea.vmem %s180_s6, 128  ;;  %p324_p3 = scmp.lt.s32.totalorder %s180_s6, %s180_s6 }
  0x2a   :  { %243 = vmatpush3.bf16.msra.mxu0 %v242_v5  ;;  %v136_v9 = vadd.f32 %v135_v6, %v46_v4  ;;  %v251_v18 = vpack.c.bf16 %v51_v16, %v50_v15  ;;  %v254_v23 = vpack.c.bf16 %v53_v21, %v52_v20  ;;  %v54_v25 = vld [vmem:[#allocation7 + $0x50] sm:$0xff]  ;;  %v55_v26 = vld [vmem:[#allocation7 + $0x58] sm:$0xff]  ;;  %v56_v30 = vld [vmem:[#allocation7 + $0x60] sm:$0xff]  ;;  %v168_v53 = vsub.s32 0, %v167_v52  ;;  %p320_p2 = scmp.ne.s32.totalorder %s180_s6, %s319_s7  ;;  %p325_p4 = scmp.lt.s32.totalorder %s319_s7, %s319_s7 }
  0x2b   :  { %244 = vmatprep.subr.bf16.mxu0 %v351_v0  ;;  %v257_v28 = vpack.c.bf16 %v55_v26, %v54_v25  ;;  %v57_v31 = vld [vmem:[#allocation7 + $0x68] sm:$0xff]  ;;  %v58_v35 = vld [vmem:[#allocation7 + $0x70] sm:$0xff]  ;;  %v59_v36 = vld [vmem:[#allocation7 + $0x78] sm:$0xff] }
  0x2c   :  { %v137_v12 = vadd.f32 %v136_v9, %v47_v7  ;;  %v260_v33 = vpack.c.bf16 %v57_v31, %v56_v30  ;;  %v263_v38 = vpack.c.bf16 %v59_v36, %v58_v35  ;;  %v61_v42 = vld [vmem:[#allocation4] sm:$0xff]  ;;  %p326_p5 = por %p325_p4, %p324_p3 }
  0x2e   :  { %246 = vmatpush3.bf16.msra.mxu0 %v245_v8  ;;  %v138_v14 = vadd.f32 %v137_v12, %v48_v10  ;;  %v134_v47 = vld [vmem:[#allocation3] sm:$0x1]  ;;  %p327_p6 = pnand %p326_p5, %p320_p2 }
  0x2f   :  { %247 = vmatprep.subr.bf16.mxu0 %v351_v0 }
  0x30   :  { %v139_v17 = vadd.f32 %v138_v14, %v49_v11 }
  0x32   :  { %249 = vmatpush3.bf16.msra.mxu0 %v248_v13  ;;  %v140_v19 = vadd.f32 %v139_v17, %v50_v15 }
  0x33   :  { %250 = vmatprep.subr.bf16.mxu0 %v351_v0 }
  0x34   :  { %v141_v22 = vadd.f32 %v140_v19, %v51_v16 }
  0x36   :  { %252 = vmatpush3.bf16.msra.mxu0 %v251_v18  ;;  %v142_v24 = vadd.f32 %v141_v22, %v52_v20 }
  0x37   :  { %253 = vmatprep.subr.bf16.mxu0 %v351_v0 }
  0x38   :  { %v143_v27 = vadd.f32 %v142_v24, %v53_v21 }
  0x3a   :  { %255 = vmatpush3.bf16.msra.mxu0 %v254_v23  ;;  %v144_v29 = vadd.f32 %v143_v27, %v54_v25 }
  0x3b   :  { %256 = vmatprep.subr.bf16.mxu0 %v351_v0 }
  0x3c   :  { %v145_v32 = vadd.f32 %v144_v29, %v55_v26 }
  0x3e   :  { %258 = vmatpush3.bf16.msra.mxu0 %v257_v28  ;;  %v146_v34 = vadd.f32 %v145_v32, %v56_v30 }
  0x3f   :  { %259 = vmatprep.subr.bf16.mxu0 %v351_v0 }
  0x40   :  { %v147_v37 = vadd.f32 %v146_v34, %v57_v31 }
  0x42   :  { %261 = vmatpush3.bf16.msra.mxu0 %v260_v33  ;;  %v148_v39 = vadd.f32 %v147_v37, %v58_v35 }
  0x43   :  { %262 = vmatprep.subr.bf16.mxu0 %v351_v0 }
  0x44   :  { %v149_v40 = vadd.f32 %v148_v39, %v59_v36 }
  0x46   :  { %264 = vmatpush3.bf16.msra.mxu0 %v263_v38  ;;  %v150_v41 = vrot.slane %v149_v40, 4 }
  0x48   :  { %v151_v43 = vadd.f32 %v150_v41, %v149_v40 }
  0x49   :  { %239 = vmatmul.mubr.f32.vlgmr.msra.gmra.mrb[0].mxu0 %v61_v42 }
  0x4a   :  { %v152_v44 = vrot.slane %v151_v43, 2 }
  0x4c   :  { %v153_v45 = vadd.f32 %v152_v44, %v151_v43 }
  0x4e   :  { %v154_v46 = vrot.slane %v153_v45, 1 }
  0x50   :  { %v155_v48 = vadd.f32 %v154_v46, %v153_v45 }
  0x52   :  { %v156_v49 = vadd.f32 %v155_v48, %v134_v47 }
  0x54   :  { %157 = vst [vmem:[#allocation3] sm:$0x1] %v156_v49 }
  0x5b   :  { %v161_v50 = vld [vmem:[#allocation3] sm:$0x1] }
  0x5c   :  { %273 = vrcp.f32 %v161_v50 }
  0x66   :  { %v274_v54 = vpop.eup %273 }
  0x67   :  { %v169_v55 = vrot.slane %v274_v54, %v168_v53 }
 0x11c   :  { %v128_v56 = vpop.f32.mrb[0].mxu0 }
 0x11d   :  { %v171_v57 = vmul.f32 %v169_v55, %v128_v56  ;;  %v240_v58 = vpop.f32.mrb[1].mxu0 }
 0x11f   :  { %172 = vst [vmem:[#allocation9] sm:$0xff] %v171_v57 }
 0x120   :  { %330 = shalt.err (!%p327_p6)
}
 0x121   :  { %s331_s10 = scalar_lea.hbm %s415_s2, 128 }
 0x122   :  { %p332_p7 = scmp.ne.s32.totalorder %s415_s2, %s331_s10  ;;  %p335_p8 = scmp.lt.u32.totalorder %s331_s10, %s415_s2 }
 0x124   :  { %p337_p9 = pnand %p335_p8, %p332_p7 }
 0x126   :  { %340 = shalt.err (!%p337_p9)
}
 0x127   :  { %182 = dma.vmem_to_hbm [thread:$0]  %s180_s6, 128, %s415_s2, [#allocation6]  }
 0x128   :  { %345 = dma.done.wait [#allocation6], 128  }
 0x129   :  { %346 = vsyncadd [#allocation6], 4294967168 }
 0x12a   :  { %186 = vsyncpa [#allocation5], 1 }
 0x12b   :  { %187 = vsyncpa [#allocation8], 1 }
 0x12c   :  { %188 = vsyncpa [#allocation6], 1 }

</bundles_post_ra>
